<compile_context>
chip_gen: v5e
topology: v5e:2x2
jax: 0.10.0
libtpu: 0.0.40
codegen_flags: <defaults>
</compile_context>

<pallas_src>
import functools

import jax
import jax.numpy as jnp
from jax.experimental import pallas as pl
from jax.experimental.pallas import tpu as pltpu


def _round_up(v, m):
    return (v + m - 1) // m * m


# ----------------------------- Pallas kernels -------------------------------

def _matmul_act_kernel(a_ref, b_ref, o_ref, *stats_refs,
                       negative_slope, operand_dtype):
    """out = act(a) @ b ; act = LeakyReLU(negative_slope) (slope 0.0 -> ReLU).

    Activation applied in f32, matmul operands cast to `operand_dtype`
    (bf16 by default) with f32 accumulation.  Optional epilogue: per-column
    sum / sum-of-squares of this block's f32 result (for fused BatchNorm).
    """
    a = a_ref[...]
    a = jnp.where(a >= 0, a, a * negative_slope)
    o = jnp.dot(a.astype(operand_dtype), b_ref[...],
                preferred_element_type=jnp.float32)
    o_ref[...] = o
    if stats_refs:
        sum_ref, sq_ref = stats_refs
        sum_ref[...] = jnp.sum(o, axis=0, keepdims=True).reshape(1, 1, -1)
        sq_ref[...] = jnp.sum(o * o, axis=0, keepdims=True).reshape(1, 1, -1)


def matmul_act(a, b, *, negative_slope, operand_dtype=jnp.bfloat16,
               block_rows=256, with_stats=False):
    """Tiled (over M) fused-activation matmul.

    - grid over M marked "parallel" (pipelining; megacore on v7x)
    - weight B kept whole + constant index_map (stays VMEM-resident)
    - output columns padded to a multiple of 128 -> lane-dense stores
    """
    M, K = a.shape
    K2, n_cols = b.shape
    assert K == K2
    npad = _round_up(n_cols, 128)
    if npad != n_cols:
        b = jnp.pad(b, ((0, 0), (0, npad - n_cols)))
    bq = b.astype(operand_dtype)

    tm = min(block_rows, _round_up(M, 8))
    mp = _round_up(M, tm)
    if mp != M:
        a = jnp.pad(a, ((0, mp - M), (0, 0)))   # act(0)=0 -> zero rows, zero stats
    gm = mp // tm

    kern = functools.partial(_matmul_act_kernel,
                             negative_slope=negative_slope,
                             operand_dtype=operand_dtype)

    out_shapes = [jax.ShapeDtypeStruct((mp, npad), jnp.float32)]
    out_specs = [pl.BlockSpec((tm, npad), lambda i: (i, 0))]
    if with_stats:
        out_shapes += [jax.ShapeDtypeStruct((gm, 1, npad), jnp.float32)] * 2
        out_specs += [pl.BlockSpec((1, 1, npad), lambda i: (i, 0, 0))] * 2

    res = pl.pallas_call(
        kern,
        out_shape=tuple(out_shapes) if with_stats else out_shapes[0],
        grid=(gm,),
        in_specs=[
            pl.BlockSpec((tm, K), lambda i: (i, 0)),
            pl.BlockSpec((K, npad), lambda i: (0, 0)),   # weight: constant block
        ],
        out_specs=tuple(out_specs) if with_stats else out_specs[0],
        compiler_params=pltpu.CompilerParams(
            dimension_semantics=("parallel",),
            vmem_limit_bytes=32 * 1024 * 1024),
    )(a, bq)

    if with_stats:
        out, s, sq = res
        return (out[:M, :n_cols],
                s[:, 0, :n_cols].sum(axis=0),
                sq[:, 0, :n_cols].sum(axis=0))
    return res[:M, :n_cols]


def _bn_concat_kernel(x_ref, u_ref, scale_ref, shift_ref, o_ref):
    """out = [x | u * scale + shift]  (BatchNorm folded to scale/shift,
    skip-concatenation fused into the same store)."""
    cin = x_ref.shape[-1]
    cout = u_ref.shape[-1]
    o_ref[:, 0:cin] = x_ref[...]
    o_ref[:, cin:cin + cout] = u_ref[...] * scale_ref[...] + shift_ref[...]


def bn_concat(x2d, u2d, scale, shift, *, block_rows=256):
    M, cin = x2d.shape
    M2, cout = u2d.shape
    assert M == M2
    tm = min(block_rows, _round_up(M, 8))
    mp = _round_up(M, tm)
    if mp != M:
        x2d = jnp.pad(x2d, ((0, mp - M), (0, 0)))
        u2d = jnp.pad(u2d, ((0, mp - M), (0, 0)))
    gm = mp // tm
    out = pl.pallas_call(
        _bn_concat_kernel,
        out_shape=jax.ShapeDtypeStruct((mp, cin + cout), jnp.float32),
        grid=(gm,),
        in_specs=[
            pl.BlockSpec((tm, cin), lambda i: (i, 0)),
            pl.BlockSpec((tm, cout), lambda i: (i, 0)),
            pl.BlockSpec((1, cout), lambda i: (0, 0)),
            pl.BlockSpec((1, cout), lambda i: (0, 0)),
        ],
        out_specs=pl.BlockSpec((tm, cin + cout), lambda i: (i, 0)),
        compiler_params=pltpu.CompilerParams(
            dimension_semantics=("parallel",),
            vmem_limit_bytes=32 * 1024 * 1024),
    )(x2d, u2d,
      scale.reshape(1, cout).astype(jnp.float32),
      shift.reshape(1, cout).astype(jnp.float32))
    return out[:M]


# ------------------------- host-side layout helpers -------------------------

def _im2col_down(x_nhwc):
    """4x4 / stride-2 / pad-1 patches: (N,H,W,C) -> (N*Ho*Wo, 16*C), tap-major."""
    N, H, W, C = x_nhwc.shape
    Ho, Wo = H // 2, W // 2
    xp = jnp.pad(x_nhwc, ((0, 0), (1, 1), (1, 1), (0, 0)))
    taps = [xp[:, kh:kh + 2 * Ho:2, kw:kw + 2 * Wo:2, :]
            for kh in range(4) for kw in range(4)]
    a = jnp.concatenate(taps, axis=-1)               # (N, Ho, Wo, 16*C)
    return a.reshape(N * Ho * Wo, 16 * C), (N, Ho, Wo)


def _im2col_up_phases(d_nhwc):
    """3x3 tap window of the zero-padded d (shared by all 4 output phases)."""
    N, h, w, C = d_nhwc.shape
    dp = jnp.pad(d_nhwc, ((0, 0), (1, 1), (1, 1), (0, 0)))
    taps = [dp[:, r:r + h, c:c + w, :] for r in range(3) for c in range(3)]
    a = jnp.concatenate(taps, axis=-1)               # (N, h, w, 9*C)
    return a.reshape(N * h * w, 9 * C), (N, h, w)


def _build_up_phase_weight(w_up):
    """ConvTranspose2d(k=4,s=2,p=1) weight (in,out,4,4) -> (9*in, 4*out).

    Row index  = tap (r*3+c over the 3x3 window of padded d) * in + ci
    Col index  = phase (a*2+b, a,b in {0,1}) * out + co
    y(n, 2p+a, 2q+b, co) = sum_{r in {a,a+1}, c in {b,b+1}, ci}
                              dp(n, p+r, q+c, ci) * W[ci, co, 3-2r+a, 3-2c+b]
    (unused taps are zero -> no structural-zero MXU rows from dilation).
    """
    inner, outer = w_up.shape[0], w_up.shape[1]
    b2 = jnp.zeros((9, inner, 2, 2, outer), w_up.dtype)
    for a in range(2):
        for b in range(2):
            for r in (a, a + 1):
                for c in (b, b + 1):
                    kh = 3 - 2 * r + a
                    kw = 3 - 2 * c + b
                    b2 = b2.at[r * 3 + c, :, a, b, :].set(w_up[:, :, kh, kw])
    return b2.reshape(9 * inner, 4 * outer)


# ------------------------------ forward pass --------------------------------

def unet_innermost_forward(x, params, *, operand_dtype=jnp.bfloat16,
                           block_rows=256):
    w_down = params["w_down"]   # (inner_nc, input_nc, 4, 4)
    w_up = params["w_up"]       # (inner_nc, outer_nc, 4, 4)  ConvTranspose layout
    gamma = params["gamma"]     # (outer_nc,)
    beta = params["beta"]       # (outer_nc,)

    N, Cin, H, W = x.shape
    inner_nc = w_down.shape[0]
    outer_nc = w_up.shape[1]

    # single layout change at the module boundary; NHWC inside.
    x_nhwc = jnp.transpose(x, (0, 2, 3, 1))

    # ---- down: LeakyReLU(0.2) + Conv2d(k4,s2,p1) as one fused matmul --------
    a1, (n, ho, wo) = _im2col_down(x_nhwc)
    b1 = jnp.transpose(w_down, (2, 3, 1, 0)).reshape(16 * Cin, inner_nc)
    d2d = matmul_act(a1, b1, negative_slope=0.2,
                     operand_dtype=operand_dtype, block_rows=block_rows)
    d_nhwc = d2d.reshape(n, ho, wo, inner_nc)        # NHWC, no transpose needed

    # ---- up: ReLU + ConvTranspose2d via 4-phase matmul + fused BN stats -----
    a2, _ = _im2col_up_phases(d_nhwc)
    b2 = _build_up_phase_weight(w_up)
    u2d, csum, csq = matmul_act(a2, b2, negative_slope=0.0,
                                operand_dtype=operand_dtype,
                                block_rows=block_rows, with_stats=True)
    # depth-to-space: (N*h*w, 2*2*outer_nc) -> (N, H, W, outer_nc)
    u_nhwc = (u2d.reshape(n, ho, wo, 2, 2, outer_nc)
                 .transpose(0, 1, 3, 2, 4, 5)
                 .reshape(n, 2 * ho, 2 * wo, outer_nc))

    # BatchNorm2d (training mode, biased variance) folded into scale/shift,
    # statistics come from the matmul epilogue (sum over blocks and phases).
    count = jnp.float32(n * ho * wo * 4)
    ch_sum = csum.reshape(4, outer_nc).sum(axis=0)
    ch_sq = csq.reshape(4, outer_nc).sum(axis=0)
    mean = ch_sum / count
    var = ch_sq / count - mean * mean
    scale = gamma * jax.lax.rsqrt(var + 1e-5)
    shift = beta - mean * scale

    # normalize + skip concatenation fused: out2d = [x | BN(up)]
    out2d = bn_concat(x_nhwc.reshape(N * H * W, Cin),
                      u_nhwc.reshape(N * H * W, outer_nc),
                      scale, shift, block_rows=block_rows)
    out = out2d.reshape(N, H, W, Cin + outer_nc).transpose(0, 3, 1, 2)  # NCHW
    return out


# --------------------------- pure-JAX reference -----------------------------

def reference_forward(x, params, operand_dtype=jnp.float32):
    """Reference with the same operand-precision policy as the kernels
    (operand_dtype=float32 -> full-precision reference)."""
    w_down, w_up = params["w_down"], params["w_up"]
    gamma, beta = params["gamma"], params["beta"]
    lrelu = jnp.where(x >= 0, x, 0.2 * x)
    d = jax.lax.conv_general_dilated(
        lrelu.astype(operand_dtype), w_down.astype(operand_dtype),
        (2, 2), ((1, 1), (1, 1)),
        dimension_numbers=("NCHW", "OIHW", "NCHW"),
        preferred_element_type=jnp.float32)
    r = jnp.maximum(d, 0.0)
    w_eq = jnp.transpose(w_up, (1, 0, 2, 3))[:, :, ::-1, ::-1]
    u = jax.lax.conv_general_dilated(
        r.astype(operand_dtype), w_eq.astype(operand_dtype),
        (1, 1), ((2, 2), (2, 2)), lhs_dilation=(2, 2),
        dimension_numbers=("NCHW", "OIHW", "NCHW"),
        preferred_element_type=jnp.float32)
    mean = u.mean(axis=(0, 2, 3), keepdims=True)
    var = ((u - mean) ** 2).mean(axis=(0, 2, 3), keepdims=True)
    u = (u - mean) * jax.lax.rsqrt(var + 1e-5) \
        * gamma.reshape(1, -1, 1, 1) + beta.reshape(1, -1, 1, 1)
    return jnp.concatenate([x, u], axis=1)


# ---------------------------------- main -------------------------------------

if __name__ == "__main__":
    # innermost block: outer_nc = input_nc = 4, inner_nc = 8
    N, input_nc, H, W = 2, 4, 16, 16
    inner_nc, outer_nc = 8, 4

    key = jax.random.PRNGKey(0)
    k1, k2, k3, k4, k5 = jax.random.split(key, 5)

    params = {
        "w_down": 0.05 * jax.random.normal(k1, (inner_nc, input_nc, 4, 4), jnp.float32),
        "w_up":   0.05 * jax.random.normal(k2, (inner_nc, outer_nc, 4, 4), jnp.float32),
        "gamma":  1.0 + 0.1 * jax.random.normal(k3, (outer_nc,), jnp.float32),
        "beta":   0.1 * jax.random.normal(k4, (outer_nc,), jnp.float32),
    }
    x = jax.random.normal(k5, (N, input_nc, H, W), jnp.float32)

    # 1) full-precision operand path: strict check against the f32 reference.
    out_f32 = jax.block_until_ready(
        unet_innermost_forward(x, params, operand_dtype=jnp.float32))
    assert out_f32.shape == (N, input_nc + outer_nc, H, W), out_f32.shape
    ref_f32 = jax.block_until_ready(reference_forward(x, params, jnp.float32))
    err_f32 = float(jnp.max(jnp.abs(out_f32 - ref_f32)))
    assert jnp.allclose(out_f32, ref_f32, atol=2e-4, rtol=2e-4), err_f32

    # 2) default bf16-operand path (MXU friendly, f32 accumulation / f32 BN):
    #    check against a reference using the same operand-precision policy.
    out_bf = jax.block_until_ready(unet_innermost_forward(x, params))
    ref_bf = jax.block_until_ready(reference_forward(x, params, jnp.bfloat16))
    err_bf = float(jnp.max(jnp.abs(out_bf - ref_bf)))
    assert jnp.allclose(out_bf, ref_bf, atol=2e-3, rtol=2e-3), err_bf

    print("KERNEL_OK")
</pallas_src>

<mosaic_0001>
module attributes {stable_mosaic.version = 11 : i64} {
  func.func @_matmul_act_kernel(%arg0: i32, %arg1: memref<128x64xf32, #tpu.memory_space<vmem>>, %arg2: memref<64x128xf32, #tpu.memory_space<vmem>>, %arg3: memref<128x128xf32, #tpu.memory_space<vmem>>) attributes {dimension_semantics = [#tpu.dimension_semantics<parallel>], iteration_bounds = array<i64: 1>, scalar_prefetch = 0 : i64, scratch_operands = 0 : i64, tpu.core_type = #tpu.core_type<tc>, window_params = [{transform_indices = @transform_0, window_bounds = array<i64: 128, 64>}, {pipeline_mode = #tpu.pipeline_mode<synchronous>, transform_indices = @transform_1, window_bounds = array<i64: 64, 128>}, {transform_indices = @transform_2, window_bounds = array<i64: 128, 128>}]} {
    %c0 = arith.constant 0 : index
    %c0_0 = arith.constant 0 : index
    %0 = vector.load %arg1[%c0, %c0_0] : memref<128x64xf32, #tpu.memory_space<vmem>>, vector<128x64xf32>
    %cst = arith.constant 0.000000e+00 : f32
    %1 = vector.broadcast %cst : f32 to vector<128x64xf32>
    %2 = arith.cmpf oge, %0, %1 : vector<128x64xf32>
    %cst_1 = arith.constant 2.000000e-01 : f32
    %3 = vector.broadcast %cst_1 : f32 to vector<128x64xf32>
    %4 = arith.mulf %0, %3 : vector<128x64xf32>
    %5 = arith.select %2, %0, %4 : vector<128x64xi1>, vector<128x64xf32>
    %c0_2 = arith.constant 0 : index
    %c0_3 = arith.constant 0 : index
    %6 = vector.load %arg2[%c0_2, %c0_3] : memref<64x128xf32, #tpu.memory_space<vmem>>, vector<64x128xf32>
    %cst_4 = arith.constant dense<0.000000e+00> : vector<128x128xf32>
    %7 = tpu.matmul %5, %6, %cst_4 {dimension_numbers = #tpu.dot_dimension_numbers<[1], [0], [0], [1], [0, 0, 1, 1], [], []>} : vector<128x64xf32>, vector<64x128xf32>, vector<128x128xf32> -> vector<128x128xf32>
    %c0_5 = arith.constant 0 : index
    %c0_6 = arith.constant 0 : index
    %8 = vector.load %arg3[%c0_5, %c0_6] : memref<128x128xf32, #tpu.memory_space<vmem>>, vector<128x128xf32>
    tpu.vector_store %arg3[%c0_5, %c0_6], %7 {strides = array<i32>} : memref<128x128xf32, #tpu.memory_space<vmem>>, vector<128x128xf32>,
    return
  }
  func.func @transform_0(%arg0: i32) -> (i32, i32) {
    %c0_i32 = arith.constant 0 : i32
    %c0_i32_0 = arith.constant 0 : i32
    return %arg0, %c0_i32 : i32, i32
  }
  func.func @transform_1(%arg0: i32) -> (i32, i32) {
    %c0_i32 = arith.constant 0 : i32
    %c0_i32_0 = arith.constant 0 : i32
    %c0_i32_1 = arith.constant 0 : i32
    return %c0_i32, %c0_i32_0 : i32, i32
  }
  func.func @transform_2(%arg0: i32) -> (i32, i32) {
    %c0_i32 = arith.constant 0 : i32
    %c0_i32_0 = arith.constant 0 : i32
    return %arg0, %c0_i32 : i32, i32
  }
}

</mosaic_0001>

<bundles_post_ra>
// kernel: tpu_custom_call.1
= control target key start
LH: loop header
LB: loop body
LE: loop exit
PB: predicated region body
PF: predicated region fallthrough
CT: control target
= control target key end

     0   :  { %s410_s0 = inlined_call_operand.vmem [shape: f32[128,64], index: 0, kind: input, shape index: {}]   ;;  %s411_s1 = inlined_call_operand.vmem [shape: f32[64,128], index: 1, kind: input, shape index: {}]   ;;  %s412_s2 = inlined_call_operand.hbm [shape: f32[128,128], index: 2, kind: output, shape index: {}]  }
   0x1   :  { %v83_v0 = vld [vmem:[%s411_s1 + $0x38] sm:$0xff]  ;;  %v82_v1 = vld [vmem:[%s411_s1 + $0x30] sm:$0xff]  ;;  %v81_v2 = vld [vmem:[%s411_s1 + $0x28] sm:$0xff] }
   0x2   :  { %249 = vmatpush.msra.mxu2 %v83_v0  ;;  %250 = vmatpush.msra.mxu3 %v83_v0  ;;  %v80_v3 = vld [vmem:[%s411_s1 + $0x20] sm:$0xff]  ;;  %v79_v4 = vld [vmem:[%s411_s1 + $0x18] sm:$0xff]  ;;  %v78_v7 = vld [vmem:[%s411_s1 + $0x10] sm:$0xff] }
   0x3   :  { %141 = vmatpush.msra.mxu0 %v83_v0  ;;  %248 = vmatpush.msra.mxu1 %v83_v0  ;;  %v20_v5 = vld [vmem:[%s410_s0 + $0x40] sm:$0xff]  ;;  %v77_v12 = vld [vmem:[%s411_s1 + $0x8] sm:$0xff] }
   0x4   :  { %252 = vmatpush.msra.mxu2 %v82_v1  ;;  %253 = vmatpush.msra.mxu3 %v82_v1  ;;  %v24_v6 = vld [vmem:[%s410_s0 + $0x60] sm:$0xff]  ;;  %v52_v10 = vmul.f32 0.2, %v20_v5  ;;  %vm36_vm0 = vcmp.ge.f32.partialorder %v20_v5, 0.0 }
   0x5   :  { %142 = vmatpush.msra.mxu0 %v82_v1  ;;  %251 = vmatpush.msra.mxu1 %v82_v1  ;;  %v12_v8 = vld [vmem:[%s410_s0] sm:$0xff]  ;;  %v56_v11 = vmul.f32 0.2, %v24_v6  ;;  %vm40_vm1 = vcmp.ge.f32.partialorder %v24_v6, 0.0 }
   0x6   :  { %255 = vmatpush.msra.mxu2 %v81_v2  ;;  %256 = vmatpush.msra.mxu3 %v81_v2  ;;  %v16_v9 = vld [vmem:[%s410_s0 + $0x20] sm:$0xff] }
   0x7   :  { %143 = vmatpush.msra.mxu0 %v81_v2  ;;  %254 = vmatpush.msra.mxu1 %v81_v2 }
   0x8   :  { %258 = vmatpush.msra.mxu2 %v80_v3  ;;  %259 = vmatpush.msra.mxu3 %v80_v3 }
   0x9   :  { %144 = vmatpush.msra.mxu0 %v80_v3  ;;  %257 = vmatpush.msra.mxu1 %v80_v3 }
   0xa   :  { %261 = vmatpush.msra.mxu2 %v79_v4  ;;  %262 = vmatpush.msra.mxu3 %v79_v4 }
   0xb   :  { %145 = vmatpush.msra.mxu0 %v79_v4  ;;  %260 = vmatpush.msra.mxu1 %v79_v4 }
   0xc   :  { %7 = vsyncpa [#allocation3], 0  ;;  %264 = vmatpush.msra.mxu2 %v78_v7  ;;  %265 = vmatpush.msra.mxu3 %v78_v7  ;;  %v44_v13 = vmul.f32 0.2, %v12_v8  ;;  %v48_v14 = vmul.f32 0.2, %v16_v9  ;;  %v68_v16 = vsel %vm36_vm0, %v20_v5, %v52_v10  ;;  %v72_v17 = vsel %vm40_vm1, %v24_v6, %v56_v11 }
   0xd   :  { %v76_v15 = vld [vmem:[%s411_s1] sm:$0xff]  ;;  %146 = vmatpush.msra.mxu0 %v78_v7  ;;  %263 = vmatpush.msra.mxu1 %v78_v7  ;;  %vm28_vm2 = vcmp.ge.f32.partialorder %v12_v8, 0.0  ;;  %vm32_vm3 = vcmp.ge.f32.partialorder %v16_v9, 0.0  ;;  %vm84_vm4 = vcmask 523264   ;;  %v21_v18 = vld [vmem:[%s410_s0 + $0x48] sm:$0xff]  ;;  %v22_v30 = vld [vmem:[%s410_s0 + $0x50] sm:$0xff] }
   0xe   :  { %267 = vmatpush.msra.mxu2 %v77_v12  ;;  %268 = vmatpush.msra.mxu3 %v77_v12  ;;  %v25_v19 = vld [vmem:[%s410_s0 + $0x68] sm:$0xff]  ;;  %v60_v20 = vsel %vm28_vm2, %v12_v8, %v44_v13  ;;  %v64_v21 = vsel %vm32_vm3, %v16_v9, %v48_v14  ;;  %v53_v24 = vmul.f32 0.2, %v21_v18  ;;  %vm37_vm5 = vcmp.ge.f32.partialorder %v21_v18, 0.0  ;;  %v26_v31 = vld [vmem:[%s410_s0 + $0x70] sm:$0xff]  ;;  %v23_v42 = vld [vmem:[%s410_s0 + $0x58] sm:$0xff] }
   0xf   :  { %147 = vmatpush.msra.mxu0 %v77_v12  ;;  %266 = vmatpush.msra.mxu1 %v77_v12  ;;  %v13_v22 = vld [vmem:[%s410_s0 + $0x8] sm:$0xff]  ;;  %v57_v25 = vmul.f32 0.2, %v25_v19  ;;  %vm41_vm6 = vcmp.ge.f32.partialorder %v25_v19, 0.0  ;;  %v14_v34 = vld [vmem:[%s410_s0 + $0x10] sm:$0xff]  ;;  %vm38_vm9 = vcmp.ge.f32.partialorder %v22_v30, 0.0 }
  0x10   :  { %270 = vmatpush.msra.mxu2 %v76_v15  ;;  %271 = vmatpush.msra.mxu3 %v76_v15  ;;  %v17_v23 = vld [vmem:[%s410_s0 + $0x28] sm:$0xff]  ;;  %v45_v26 = vmul.f32 0.2, %v13_v22  ;;  %vm29_vm7 = vcmp.ge.f32.partialorder %v13_v22, 0.0  ;;  %v69_v28 = vsel %vm37_vm5, %v21_v18, %v53_v24  ;;  %v18_v35 = vld [vmem:[%s410_s0 + $0x30] sm:$0xff]  ;;  %vm42_vm10 = vcmp.ge.f32.partialorder %v26_v31, 0.0 }
  0x11   :  { %240 = vmatmul.msk.f32.vlgmr.msra.gmra.mxu2 %vm84_vm4, %v68_v16  ;;  %244 = vmatmul.msk.f32.vlgmr.msra.gmra.mxu3 %vm84_vm4, %v72_v17  ;;  %v49_v27 = vmul.f32 0.2, %v17_v23  ;;  %vm33_vm8 = vcmp.ge.f32.partialorder %v17_v23, 0.0  ;;  %v73_v29 = vsel %vm41_vm6, %v25_v19, %v57_v25  ;;  %v54_v36 = vmul.f32 0.2, %v22_v30  ;;  %v27_v43 = vld [vmem:[%s410_s0 + $0x78] sm:$0xff] }
  0x12   :  { %148 = vmatpush.msra.mxu0 %v76_v15  ;;  %269 = vmatpush.msra.mxu1 %v76_v15  ;;  %v61_v32 = vsel %vm29_vm7, %v13_v22, %v45_v26  ;;  %v58_v37 = vmul.f32 0.2, %v26_v31  ;;  %v46_v38 = vmul.f32 0.2, %v14_v34  ;;  %v50_v39 = vmul.f32 0.2, %v18_v35 }
  0x13   :  { %232 = vmatmul.msk.f32.vlgmr.msra.gmra.mxu0 %vm84_vm4, %v60_v20  ;;  %236 = vmatmul.msk.f32.vlgmr.msra.gmra.mxu1 %vm84_vm4, %v64_v21  ;;  %v65_v33 = vsel %vm33_vm8, %v17_v23, %v49_v27  ;;  %vm30_vm11 = vcmp.ge.f32.partialorder %v14_v34, 0.0  ;;  %vm34_vm12 = vcmp.ge.f32.partialorder %v18_v35, 0.0  ;;  %v70_v40 = vsel %vm38_vm9, %v22_v30, %v54_v36  ;;  %v15_v46 = vld [vmem:[%s410_s0 + $0x18] sm:$0xff]  ;;  %s220_s3 = sshll.u32 %s412_s2, 4  ;;  %s302_s4 = smov 128   ;;  %s221_s3 = int_to_ptr.hbm [resolvable:$true] %s220_s3 }
  0x14   :  { %v74_v41 = vsel %vm42_vm10, %v26_v31, %v58_v37  ;;  %v62_v44 = vsel %vm30_vm11, %v14_v34, %v46_v38  ;;  %v66_v45 = vsel %vm34_vm12, %v18_v35, %v50_v39  ;;  %v19_v47 = vld [vmem:[%s410_s0 + $0x38] sm:$0xff]  ;;  %v55_v48 = vmul.f32 0.2, %v23_v42  ;;  %s301_s0 = smov [#allocation2]   ;;  %s303_s5 = smov 8  }
  0x15   :  { %v59_v49 = vmul.f32 0.2, %v27_v43  ;;  %vm39_vm13 = vcmp.ge.f32.partialorder %v23_v42, 0.0  ;;  %vm43_vm14 = vcmp.ge.f32.partialorder %v27_v43, 0.0  ;;  %v47_v50 = vmul.f32 0.2, %v15_v46 }
  0x16   :  { %v51_v51 = vmul.f32 0.2, %v19_v47  ;;  %vm31_vm15 = vcmp.ge.f32.partialorder %v15_v46, 0.0  ;;  %vm35_vm0 = vcmp.ge.f32.partialorder %v19_v47, 0.0  ;;  %v71_v52 = vsel %vm39_vm13, %v23_v42, %v55_v48  ;;  %s218_s28 = sshll.u32 %s301_s0, 4  ;;  %s219_s28 = int_to_ptr.vmem [resolvable:$true] %s218_s28 }
  0x17   :  { %v75_v53 = vsel %vm43_vm14, %v27_v43, %v59_v49  ;;  %v63_v54 = vsel %vm31_vm15, %v15_v46, %v47_v50 }
  0x18   :  { %v67_v55 = vsel %vm35_vm0, %v19_v47, %v51_v51 }
  0x19   :  { %241 = vmatmul.msk.f32.gmra.mxu2 %vm84_vm4, %v69_v28  ;;  %245 = vmatmul.msk.f32.gmra.mxu3 %vm84_vm4, %v73_v29 }
  0x1b   :  { %233 = vmatmul.msk.f32.gmra.mxu0 %vm84_vm4, %v61_v32  ;;  %237 = vmatmul.msk.f32.gmra.mxu1 %vm84_vm4, %v65_v33 }
  0x21   :  { %242 = vmatmul.msk.f32.gmra.mxu2 %vm84_vm4, %v70_v40  ;;  %246 = vmatmul.msk.f32.gmra.mxu3 %vm84_vm4, %v74_v41 }
  0x23   :  { %234 = vmatmul.msk.f32.gmra.mxu0 %vm84_vm4, %v62_v44  ;;  %238 = vmatmul.msk.f32.gmra.mxu1 %vm84_vm4, %v66_v45 }
  0x29   :  { %243 = vmatmul.msk.f32.gmra.mxu2 %vm84_vm4, %v71_v52  ;;  %247 = vmatmul.msk.f32.gmra.mxu3 %vm84_vm4, %v75_v53 }
  0x2b   :  { %235 = vmatmul.msk.f32.gmra.mxu0 %vm84_vm4, %v63_v54  ;;  %239 = vmatmul.msk.f32.gmra.mxu1 %vm84_vm4, %v67_v55 }
  0x90   :  { %v150_v56 = vpop.f32.mrf.mxu0  ;;  %v162_v57 = vpop.f32.mrf.mxu1 }
  0x91   :  { %198 = vst [vmem:[#allocation2] sm:$0xff] %v150_v56 }
  0x92   :  { %202 = vst [vmem:[#allocation2 + $0x20] sm:$0xff] %v162_v57 }
  0x94   :  { %v174_v58 = vpop.f32.mrf.mxu2  ;;  %v186_v59 = vpop.f32.mrf.mxu3 }
  0x95   :  { %206 = vst [vmem:[#allocation2 + $0x40] sm:$0xff] %v174_v58 }
  0x96   :  { %210 = vst [vmem:[#allocation2 + $0x60] sm:$0xff] %v186_v59 }
  0x98   :  { %v153_v60 = vpop.f32.mrf.mxu0  ;;  %v165_v61 = vpop.f32.mrf.mxu1 }
  0x99   :  { %199 = vst [vmem:[#allocation2 + $0x8] sm:$0xff] %v153_v60 }
  0x9a   :  { %203 = vst [vmem:[#allocation2 + $0x28] sm:$0xff] %v165_v61 }
  0x9c   :  { %v177_v62 = vpop.f32.mrf.mxu2  ;;  %v189_v63 = vpop.f32.mrf.mxu3 }
  0x9d   :  { %207 = vst [vmem:[#allocation2 + $0x48] sm:$0xff] %v177_v62 }
  0x9e   :  { %211 = vst [vmem:[#allocation2 + $0x68] sm:$0xff] %v189_v63 }
  0xa0   :  { %v156_v0 = vpop.f32.mrf.mxu0  ;;  %v168_v1 = vpop.f32.mrf.mxu1 }
  0xa1   :  { %200 = vst [vmem:[#allocation2 + $0x10] sm:$0xff] %v156_v0 }
  0xa2   :  { %204 = vst [vmem:[#allocation2 + $0x30] sm:$0xff] %v168_v1 }
  0xa4   :  { %v180_v2 = vpop.f32.mrf.mxu2  ;;  %v192_v3 = vpop.f32.mrf.mxu3 }
  0xa5   :  { %208 = vst [vmem:[#allocation2 + $0x50] sm:$0xff] %v180_v2 }
  0xa6   :  { %212 = vst [vmem:[#allocation2 + $0x70] sm:$0xff] %v192_v3 }
  0xa8   :  { %v159_v4 = vpop.f32.mrf.mxu0  ;;  %v171_v5 = vpop.f32.mrf.mxu1 }
  0xa9   :  { %201 = vst [vmem:[#allocation2 + $0x18] sm:$0xff] %v159_v4 }
  0xaa   :  { %205 = vst [vmem:[#allocation2 + $0x38] sm:$0xff] %v171_v5 }
  0xac   :  { %v183_v6 = vpop.f32.mrf.mxu2  ;;  %v195_v7 = vpop.f32.mrf.mxu3 }
  0xad   :  { %209 = vst [vmem:[#allocation2 + $0x58] sm:$0xff] %v183_v6 }
  0xae   :  { %213 = vst [vmem:[#allocation2 + $0x78] sm:$0xff] %v195_v7 }
  0xaf   :  { %226 = dma.vmem_to_hbm [thread:$0]  %s219_s28, 2048, %s221_s3, [#allocation3], %s302_s4, %s302_s4, %s303_s5  }
  0xb0   :  { %299 = dma.done.wait [#allocation3], 2048  }
  0xb1   :  { %300 = vsyncadd [#allocation3], 4294965248 }
  0xb2   :  { %231 = vsyncpa [#allocation3], 1 }

</bundles_post_ra>
